<compile_context>
chip_gen: v5e
topology: v5e:2x2
jax: 0.10.0
libtpu: 0.0.40
codegen_flags: <defaults>
</compile_context>

<pallas_src>
from functools import partial

import jax
import jax.numpy as jnp
from jax.experimental import pallas as pl
from jax.experimental.pallas import tpu as pltpu

EPS = 1e-5  # float32 path: weight-standardization eps and nn.GroupNorm default eps


# ----------------------------- kernels ------------------------------------ #

def _ws_kernel(w_ref, o_ref):
    """Weight standardization (per output channel = per column), emits bf16."""
    w = w_ref[...]                                        # (K, Cout) f32
    m = jnp.mean(w, axis=0, keepdims=True)
    v = jnp.mean((w - m) ** 2, axis=0, keepdims=True)     # biased variance
    o_ref[...] = ((w - m) * jax.lax.rsqrt(v + EPS)).astype(o_ref.dtype)


def _fused_kernel(xp_ref, t_ref, mw_ref, mb_ref,
                  w1_ref, b1_ref, g1_ref, be1_ref,
                  w2_ref, b2_ref, g2_ref, be2_ref,
                  *rest, H, W, F, groups, has_res):
    """block1 (WSConv3x3 + GN + scale/shift + SiLU) ->
       block2 (WSConv3x3 + GN + SiLU) -> 1x1 res conv + add, for one sample,
       entirely in VMEM.  Activations live in a padded-flat spatial layout of
       length L = H*(W+2) (rows 1..H of the zero-padded image, all columns);
       the extra pad columns are masked out of the GroupNorm statistics and
       zeroed before block2's conv reads them."""
    if has_res:
        rw_ref, rb_ref, o_ref, h1pad = rest
    else:
        rw_ref = rb_ref = None
        o_ref, h1pad = rest

    W2 = W + 2
    L = H * W2
    Cout = b1_ref.shape[1]
    cg = Cout // groups
    cnt = jnp.float32(H * W * cg)

    # spatial-validity mask over the slab (pad columns x==0 / x==W+1 invalid).
    # Float-only index math (exact for these magnitudes) for robust lowering.
    li = jax.lax.broadcasted_iota(jnp.int32, (L, 1), 0).astype(jnp.float32)
    col = li - jnp.floor(li / W2) * W2
    mask = jnp.logical_and(col > 0.5, col < W + 0.5).astype(jnp.float32)

    # channel -> same-group matrix for the GroupNorm group reduction
    gi = jnp.floor(
        jax.lax.broadcasted_iota(jnp.int32, (Cout, Cout), 0).astype(jnp.float32) / cg)
    gj = jnp.floor(
        jax.lax.broadcasted_iota(jnp.int32, (Cout, Cout), 1).astype(jnp.float32) / cg)
    gmat = (jnp.abs(gi - gj) < 0.5).astype(jnp.float32)  # (Cout, Cout)

    def conv3x3(read_tap, w9_ref, b_ref):
        # 9 shifted-slice matmuls accumulated in f32 (bf16 MXU inputs).
        acc = jnp.zeros((L, Cout), jnp.float32)
        for dy in range(3):
            for dx in range(3):
                start = dy * W2 + dx - 1 + F              # static offset
                acc += jnp.dot(read_tap(start).astype(jnp.bfloat16),
                               w9_ref[dy * 3 + dx],
                               preferred_element_type=jnp.float32)
        return acc + b_ref[...]

    def group_norm(h, gamma, beta):
        # two-pass masked stats (mean, then centered variance)
        s1 = jnp.sum(h * mask, axis=0, keepdims=True)                       # (1, Cout)
        mean_c = jnp.dot(s1, gmat, preferred_element_type=jnp.float32) / cnt
        d = (h - mean_c) * mask
        s2 = jnp.sum(d * d, axis=0, keepdims=True)
        var_c = jnp.dot(s2, gmat, preferred_element_type=jnp.float32) / cnt
        return (h - mean_c) * jax.lax.rsqrt(var_c + EPS) * gamma + beta

    # --- time-embedding MLP: (scale, shift) = chunk2(Linear(SiLU(t)))
    t = t_ref[0]                                          # (1, T)
    t = t * jax.nn.sigmoid(t)                             # SiLU
    te = jnp.dot(t.astype(jnp.bfloat16), mw_ref[...],
                 preferred_element_type=jnp.float32) + mb_ref[...]          # (1, 2*Cout)
    scale = te[:, :Cout]
    shift = te[:, Cout:]

    # --- block1
    h = conv3x3(lambda s: xp_ref[0, pl.ds(s, L), :], w1_ref, b1_ref)
    h = group_norm(h, g1_ref[...], be1_ref[...])
    h = h * (scale + 1.0) + shift
    h = h * jax.nn.sigmoid(h)                             # SiLU

    # stage h1 into the padded-flat VMEM scratch (zero ring = block2's padding)
    head = W2 + F
    tail = h1pad.shape[0] - head - L
    h1pad[pl.ds(0, head), :] = jnp.zeros((head, Cout), jnp.float32)
    h1pad[pl.ds(head, L), :] = h * mask
    h1pad[pl.ds(head + L, tail), :] = jnp.zeros((tail, Cout), jnp.float32)

    # --- block2 (no scale/shift)
    h2 = conv3x3(lambda s: h1pad[pl.ds(s, L), :], w2_ref, b2_ref)
    h2 = group_norm(h2, g2_ref[...], be2_ref[...])
    h2 = h2 * jax.nn.sigmoid(h2)                          # SiLU

    # --- residual branch + add
    x_slab = xp_ref[0, pl.ds(head, L), :]                 # (L, Cin), zeros at pad cols
    if has_res:
        res = jnp.dot(x_slab.astype(jnp.bfloat16), rw_ref[...],
                      preferred_element_type=jnp.float32) + rb_ref[...]
    else:
        res = x_slab                                      # nn.Identity
    o_ref[0] = (h2 + res).astype(o_ref.dtype)


# ------------------------------ wrappers ----------------------------------- #

def _ws_normalize(w2d):
    """One-shot weight standardization -> bf16 weights (hoisted out of the grid)."""
    K, Cout = w2d.shape
    return pl.pallas_call(
        _ws_kernel,
        out_shape=jax.ShapeDtypeStruct((K, Cout), jnp.bfloat16),
        grid=(1,),
        in_specs=[pl.BlockSpec((K, Cout), lambda i: (0, 0))],
        out_specs=pl.BlockSpec((K, Cout), lambda i: (0, 0)),
    )(w2d)


def _run_fused(xp_full, t3, mlp_w, mlp_b, w1, b1, g1, be1, w2, b2, g2, be2,
               res_w, res_b, *, H, W, F, groups):
    B, Ppad, Cin = xp_full.shape
    Cout = b1.shape[1]
    W2 = W + 2
    L = H * W2
    has_res = res_w is not None

    def full(a):
        return pl.BlockSpec(a.shape, lambda b, _nd=a.ndim: (0,) * _nd)

    in_specs = [
        pl.BlockSpec((1, Ppad, Cin), lambda b: (b, 0, 0)),       # padded input slab
        pl.BlockSpec((1, 1, t3.shape[2]), lambda b: (b, 0, 0)),  # time embedding
        full(mlp_w), full(mlp_b),
        full(w1), full(b1), full(g1), full(be1),
        full(w2), full(b2), full(g2), full(be2),
    ]
    args = [xp_full, t3, mlp_w, mlp_b, w1, b1, g1, be1, w2, b2, g2, be2]
    if has_res:
        in_specs += [full(res_w), full(res_b)]
        args += [res_w, res_b]

    kernel = partial(_fused_kernel, H=H, W=W, F=F, groups=groups, has_res=has_res)
    return pl.pallas_call(
        kernel,
        out_shape=jax.ShapeDtypeStruct((B, L, Cout), jnp.float32),
        grid=(B,),
        in_specs=in_specs,
        out_specs=pl.BlockSpec((1, L, Cout), lambda b: (b, 0, 0)),
        scratch_shapes=[pltpu.VMEM((Ppad, Cout), jnp.float32)],   # staged h1
        compiler_params=pltpu.CompilerParams(dimension_semantics=("parallel",)),
    )(*args)


def resnet_block_forward(x_nhwc, time_emb, params, *, groups):
    """ResnetBlock.forward (NHWC).  x: (B,H,W,dim), time_emb: (B,time_emb_dim)."""
    B, H, W, Cin = x_nhwc.shape
    Cout = params["b1_bias"].shape[1]
    W2 = W + 2
    L = H * W2
    P = (H + 2) * W2
    F = (-W2) % 8                       # front pad so the staged-h1 store is 8-aligned
    if F == 0:
        F = 8                           # F >= 1 needed by the (dy=0, dx=0) tap
    Ppad = -(-(2 * W2 + 1 + F + L) // 8) * 8   # covers the farthest tap read

    # weight standardization, hoisted out of the per-sample grid (done once)
    wn1 = _ws_normalize(params["b1_w"].reshape(9 * Cin, Cout)).reshape(9, Cin, Cout)
    wn2 = _ws_normalize(params["b2_w"].reshape(9 * Cout, Cout)).reshape(9, Cout, Cout)

    # zero-padded, spatially flattened NHWC input slab (layout glue only, 1x copy)
    xp = jnp.pad(x_nhwc, ((0, 0), (1, 1), (1, 1), (0, 0)))
    xp_full = jnp.pad(xp.reshape(B, P, Cin), ((0, 0), (F, Ppad - F - P), (0, 0)))

    t3 = time_emb.reshape(B, 1, time_emb.shape[1])
    res_w = params["res_w"].astype(jnp.bfloat16) if "res_w" in params else None
    res_b = params.get("res_b")

    out_slab = _run_fused(
        xp_full, t3, params["mlp_w"].astype(jnp.bfloat16), params["mlp_b"],
        wn1, params["b1_bias"], params["b1_gamma"], params["b1_beta"],
        wn2, params["b2_bias"], params["b2_gamma"], params["b2_beta"],
        res_w, res_b, H=H, W=W, F=F, groups=groups)

    # drop the pad columns (glue)
    return out_slab.reshape(B, H, W2, Cout)[:, :, 1:W + 1, :]


# --------------------------- params / reference ---------------------------- #

def init_params(key, dim, dim_out, time_emb_dim):
    ks = jax.random.split(key, 8)
    p = {
        "b1_w": jax.random.normal(ks[0], (3, 3, dim, dim_out), jnp.float32) * 0.1,
        "b1_bias": jax.random.normal(ks[1], (1, dim_out), jnp.float32) * 0.1,
        "b1_gamma": jnp.ones((1, dim_out), jnp.float32),         # PyTorch GroupNorm init
        "b1_beta": jnp.zeros((1, dim_out), jnp.float32),
        "b2_w": jax.random.normal(ks[2], (3, 3, dim_out, dim_out), jnp.float32) * 0.1,
        "b2_bias": jax.random.normal(ks[3], (1, dim_out), jnp.float32) * 0.1,
        "b2_gamma": jnp.ones((1, dim_out), jnp.float32),
        "b2_beta": jnp.zeros((1, dim_out), jnp.float32),
        "mlp_w": jax.random.normal(ks[4], (time_emb_dim, dim_out * 2), jnp.float32) * 0.1,
        "mlp_b": jax.random.normal(ks[5], (1, dim_out * 2), jnp.float32) * 0.1,
    }
    if dim != dim_out:
        p["res_w"] = jax.random.normal(ks[6], (dim, dim_out), jnp.float32) * 0.1
        p["res_b"] = jax.random.normal(ks[7], (1, dim_out), jnp.float32) * 0.1
    return p


def ref_forward(x, time_emb, params, *, groups):
    """Pure-JAX reference mirroring the PyTorch forward (NHWC)."""
    silu = lambda v: v * jax.nn.sigmoid(v)

    def ws_conv(xa, w_hwio, b):
        m = jnp.mean(w_hwio, axis=(0, 1, 2), keepdims=True)
        v = jnp.mean((w_hwio - m) ** 2, axis=(0, 1, 2), keepdims=True)
        wn = (w_hwio - m) * jax.lax.rsqrt(v + EPS)
        y = jax.lax.conv_general_dilated(
            xa, wn, (1, 1), 'SAME', dimension_numbers=('NHWC', 'HWIO', 'NHWC'))
        return y + b.reshape(1, 1, 1, -1)

    def gn(xa, gamma, beta):
        B, H, W, C = xa.shape
        xg = xa.reshape(B, H, W, groups, C // groups)
        m = jnp.mean(xg, axis=(1, 2, 4), keepdims=True)
        v = jnp.mean((xg - m) ** 2, axis=(1, 2, 4), keepdims=True)
        xn = ((xg - m) * jax.lax.rsqrt(v + EPS)).reshape(B, H, W, C)
        return xn * gamma.reshape(1, 1, 1, -1) + beta.reshape(1, 1, 1, -1)

    Cout = params["b1_bias"].shape[1]
    t = jnp.dot(silu(time_emb), params["mlp_w"]) + params["mlp_b"]
    scale, shift = t[:, :Cout], t[:, Cout:]

    h = ws_conv(x, params["b1_w"], params["b1_bias"])
    h = gn(h, params["b1_gamma"], params["b1_beta"])
    h = h * (scale[:, None, None, :] + 1.0) + shift[:, None, None, :]
    h = silu(h)

    h = ws_conv(h, params["b2_w"], params["b2_bias"])
    h = gn(h, params["b2_gamma"], params["b2_beta"])
    h = silu(h)

    if "res_w" in params:
        res = jnp.einsum('bhwc,co->bhwo', x, params["res_w"]) + params["res_b"].reshape(1, 1, 1, -1)
    else:
        res = x
    return h + res


# -------------------------------- main ------------------------------------- #

if __name__ == "__main__":
    B, H, W = 2, 16, 16
    dim, dim_out, groups, time_emb_dim = 4, 8, 4, 32

    key = jax.random.PRNGKey(0)
    kx, kt, kp = jax.random.split(key, 3)
    x = jax.random.normal(kx, (B, H, W, dim), jnp.float32)       # NHWC (== NCHW [2,4,16,16])
    time_emb = jax.random.normal(kt, (B, time_emb_dim), jnp.float32)
    params = init_params(kp, dim, dim_out, time_emb_dim)

    out = resnet_block_forward(x, time_emb, params, groups=groups)
    out = jax.block_until_ready(out)
    assert out.shape == (B, H, W, dim_out)

    ref = ref_forward(x, time_emb, params, groups=groups)
    ref = jax.block_until_ready(ref)
    rel_err = float(jnp.max(jnp.abs(out - ref)) / (jnp.max(jnp.abs(ref)) + 1e-6))
    assert rel_err < 3e-2, f"relative error too large: {rel_err}"

    print("KERNEL_OK")
</pallas_src>

<mosaic_0001>
module attributes {stable_mosaic.version = 11 : i64} {
  func.func @_ws_kernel(%arg0: i32, %arg1: memref<36x8xf32, #tpu.memory_space<vmem>>, %arg2: memref<36x8xbf16, #tpu.memory_space<vmem>>) attributes {dimension_semantics = [#tpu.dimension_semantics<arbitrary>], iteration_bounds = array<i64: 1>, scalar_prefetch = 0 : i64, scratch_operands = 0 : i64, tpu.core_type = #tpu.core_type<tc>, window_params = [{pipeline_mode = #tpu.pipeline_mode<synchronous>, transform_indices = @transform_0, window_bounds = array<i64: 36, 8>}, {pipeline_mode = #tpu.pipeline_mode<synchronous>, transform_indices = @transform_1, window_bounds = array<i64: 36, 8>}]} {
    %c0 = arith.constant 0 : index
    %c0_0 = arith.constant 0 : index
    %0 = vector.load %arg1[%c0, %c0_0] : memref<36x8xf32, #tpu.memory_space<vmem>>, vector<36x8xf32>
    %cst = arith.constant dense<0.000000e+00> : vector<8xf32>
    %1 = vector.multi_reduction <add>, %0, %cst [0] : vector<36x8xf32> to vector<8xf32>
    %2 = vector.shape_cast %1 : vector<8xf32> to vector<1x8xf32>
    %cst_1 = arith.constant 3.600000e+01 : f32
    %3 = vector.broadcast %cst_1 : f32 to vector<1x8xf32>
    %4 = arith.divf %2, %3 : vector<1x8xf32>
    %5 = vector.broadcast %4 : vector<1x8xf32> to vector<36x8xf32>
    %6 = arith.subf %0, %5 : vector<36x8xf32>
    %7 = arith.mulf %6, %6 : vector<36x8xf32>
    %cst_2 = arith.constant dense<0.000000e+00> : vector<8xf32>
    %8 = vector.multi_reduction <add>, %7, %cst_2 [0] : vector<36x8xf32> to vector<8xf32>
    %9 = vector.shape_cast %8 : vector<8xf32> to vector<1x8xf32>
    %cst_3 = arith.constant 3.600000e+01 : f32
    %10 = vector.broadcast %cst_3 : f32 to vector<1x8xf32>
    %11 = arith.divf %9, %10 : vector<1x8xf32>
    %12 = vector.broadcast %4 : vector<1x8xf32> to vector<36x8xf32>
    %13 = arith.subf %0, %12 : vector<36x8xf32>
    %cst_4 = arith.constant 9.99999974E-6 : f32
    %14 = vector.broadcast %cst_4 : f32 to vector<1x8xf32>
    %15 = arith.addf %11, %14 : vector<1x8xf32>
    %16 = math.rsqrt %15 : vector<1x8xf32>
    %17 = vector.broadcast %16 : vector<1x8xf32> to vector<36x8xf32>
    %18 = arith.mulf %13, %17 : vector<36x8xf32>
    %19 = arith.truncf %18 : vector<36x8xf32> to vector<36x8xbf16>
    %c0_5 = arith.constant 0 : index
    %c0_6 = arith.constant 0 : index
    %20 = vector.load %arg2[%c0_5, %c0_6] : memref<36x8xbf16, #tpu.memory_space<vmem>>, vector<36x8xbf16>
    tpu.vector_store %arg2[%c0_5, %c0_6], %19 {strides = array<i32>} : memref<36x8xbf16, #tpu.memory_space<vmem>>, vector<36x8xbf16>,
    return
  }
  func.func @transform_0(%arg0: i32) -> (i32, i32) {
    %c0_i32 = arith.constant 0 : i32
    %c0_i32_0 = arith.constant 0 : i32
    %c0_i32_1 = arith.constant 0 : i32
    return %c0_i32, %c0_i32_0 : i32, i32
  }
  func.func @transform_1(%arg0: i32) -> (i32, i32) {
    %c0_i32 = arith.constant 0 : i32
    %c0_i32_0 = arith.constant 0 : i32
    %c0_i32_1 = arith.constant 0 : i32
    return %c0_i32, %c0_i32_0 : i32, i32
  }
}

</mosaic_0001>

<bundles_post_ra>
// kernel: tpu_custom_call.1
= control target key start
LH: loop header
LB: loop body
LE: loop exit
PB: predicated region body
PF: predicated region fallthrough
CT: control target
= control target key end

     0   :  { %vm13_vm0 = vcmask 64512   ;;  %v100_v3 = vmov 36.0   ;;  %vm21_vm1 = vcmask 60416   ;;  %vm89_vm6 = vcmask 58368   ;;  %s155_s0 = inlined_call_operand.vmem [shape: f32[36,8], index: 0, kind: input, shape index: {}]   ;;  %s156_s1 = inlined_call_operand.vmem [shape: bf16[36,8], index: 1, kind: output, shape index: {}]  }
   0x1   :  { %v8_v0 = vld [vmem:[%s155_s0] sm:$0xff]  ;;  %v9_v1 = vld [vmem:[%s155_s0 + $0x8] sm:$0xff]  ;;  %v10_v2 = vld [vmem:[%s155_s0 + $0x10] sm:$0xff]  ;;  %96 = vrcp.f32 %v100_v3 }
   0x2   :  { %v11_v4 = vld [vmem:[%s155_s0 + $0x18] sm:$0xff]  ;;  %v14_v5 = vsel %vm13_vm0, %v8_v0, 0.0  ;;  %v15_v6 = vsel %vm13_vm0, %v9_v1, 0.0  ;;  %v17_v7 = vsel %vm13_vm0, %v10_v2, 0.0  ;;  %v12_v8 = vld [vmem:[%s155_s0 + $0x20] sm:$0xf] }
   0x3   :  { %v16_v9 = vadd.f32 %v15_v6, %v14_v5  ;;  %v19_v10 = vsel %vm13_vm0, %v11_v4, 0.0  ;;  %v22_v12 = vsel %vm21_vm1, %v12_v8, 0.0 }
   0x5   :  { %v18_v11 = vadd.f32 %v17_v7, %v16_v9 }
   0x7   :  { %v97_v13 = vpop.eup %96  ;;  %v20_v14 = vadd.f32 %v19_v10, %v18_v11 }
   0x8   :  { %v31_v15 = vmul.f32 36.0, %v97_v13  ;;  %vm35_vm2 = vweird.f32 %v97_v13 }
   0x9   :  { %v23_v16 = vadd.f32 %v22_v12, %v20_v14 }
   0xa   :  { %v32_v17 = vsub.f32 1.0, %v31_v15 }
   0xb   :  { %v24_v18 = vrot.slane %v23_v16, 4 }
   0xc   :  { %v33_v19 = vmul.f32 %v97_v13, %v32_v17 }
   0xd   :  { %v25_v20 = vadd.f32 %v24_v18, %v23_v16 }
   0xe   :  { %v34_v22 = vadd.f32 %v97_v13, %v33_v19 }
   0xf   :  { %v26_v21 = vrot.slane %v25_v20, 2 }
  0x10   :  { %v36_v25 = vsel %vm35_vm2, %v97_v13, %v34_v22 }
  0x11   :  { %v27_v23 = vadd.f32 %v26_v21, %v25_v20 }
  0x13   :  { %v28_v24 = vrot.slane %v27_v23, 1 }
  0x15   :  { %v29_v26 = vadd.f32 %v28_v24, %v27_v23 }
  0x17   :  { %v37_v27 = vmul.f32 %v36_v25, %v29_v26 }
  0x19   :  { %v38_v28 = vsub.f32 %v8_v0, %v37_v27  ;;  %v39_v29 = vsub.f32 %v9_v1, %v37_v27  ;;  %v40_v30 = vsub.f32 %v10_v2, %v37_v27  ;;  %v41_v31 = vsub.f32 %v11_v4, %v37_v27 }
  0x1a   :  { %v42_v32 = vsub.f32 %v12_v8, %v37_v27 }
  0x1b   :  { %v43_v33 = vmul.f32 %v38_v28, %v38_v28  ;;  %v44_v34 = vmul.f32 %v39_v29, %v39_v29  ;;  %v45_v35 = vmul.f32 %v40_v30, %v40_v30  ;;  %v46_v36 = vmul.f32 %v41_v31, %v41_v31 }
  0x1c   :  { %v47_v37 = vmul.f32 %v42_v32, %v42_v32 }
  0x1d   :  { %v48_v38 = vsel %vm13_vm0, %v43_v33, 0.0  ;;  %v49_v39 = vsel %vm13_vm0, %v44_v34, 0.0  ;;  %v51_v40 = vsel %vm13_vm0, %v45_v35, 0.0  ;;  %v53_v42 = vsel %vm13_vm0, %v46_v36, 0.0 }
  0x1e   :  { %v50_v41 = vadd.f32 %v49_v39, %v48_v38  ;;  %v55_v44 = vsel %vm21_vm1, %v47_v37, 0.0 }
  0x20   :  { %v52_v43 = vadd.f32 %v51_v40, %v50_v41 }
  0x22   :  { %v54_v45 = vadd.f32 %v53_v42, %v52_v43 }
  0x24   :  { %v56_v46 = vadd.f32 %v55_v44, %v54_v45 }
  0x26   :  { %v57_v47 = vrot.slane %v56_v46, 4 }
  0x28   :  { %v58_v48 = vadd.f32 %v57_v47, %v56_v46 }
  0x2a   :  { %v59_v49 = vrot.slane %v58_v48, 2 }
  0x2c   :  { %v60_v50 = vadd.f32 %v59_v49, %v58_v48 }
  0x2e   :  { %v61_v51 = vrot.slane %v60_v50, 1 }
  0x30   :  { %v62_v52 = vadd.f32 %v61_v51, %v60_v50 }
  0x32   :  { %v63_v53 = vmul.f32 %v62_v52, %v36_v25 }
  0x34   :  { %v64_v54 = vadd.f32 1e-05, %v63_v53 }
  0x36   :  { %98 = vrsqrt.f32 %v64_v54  ;;  %vm71_vm3 = vweird.f32 %v64_v54 }
  0x3c   :  { %v99_v55 = vpop.eup %98 }
  0x3d   :  { %v66_v56 = vmul.f32 %v99_v55, %v64_v54  ;;  %vm72_vm4 = vweird.f32 %v99_v55 }
  0x3e   :  { %vm73_vm5 = vmor %vm71_vm3, %vm72_vm4 }
  0x3f   :  { %v67_v57 = vmul.f32 %v99_v55, %v66_v56 }
  0x41   :  { %v68_v58 = vmul.f32 0.5, %v67_v57 }
  0x43   :  { %v69_v59 = vsub.f32 1.5, %v68_v58 }
  0x45   :  { %v70_v60 = vmul.f32 %v99_v55, %v69_v59 }
  0x47   :  { %v74_v61 = vsel %vm73_vm5, %v99_v55, %v70_v60 }
  0x48   :  { %v75_v62 = vmul.f32 %v74_v61, %v38_v28  ;;  %v76_v63 = vmul.f32 %v74_v61, %v39_v29  ;;  %v77_v0 = vmul.f32 %v74_v61, %v40_v30  ;;  %v78_v1 = vmul.f32 %v74_v61, %v41_v31 }
  0x49   :  { %v79_v2 = vmul.f32 %v74_v61, %v42_v32 }
  0x4a   :  { %v80_v3 = vpack.c.bf16 %v75_v62, %v75_v62  ;;  %v81_v4 = vpack.c.bf16 %v76_v63, %v76_v63  ;;  %v82_v5 = vpack.c.bf16 %v77_v0, %v77_v0  ;;  %v83_v6 = vpack.c.bf16 %v78_v1, %v78_v1 }
  0x4b   :  { %v84_v7 = vpack.c.bf16 %v79_v2, %v79_v2 }
  0x4c   :  { %85 = vst.msk [vmem:[%s156_s1] sm:$0xf] %vm21_vm1, %v80_v3 }
  0x4d   :  { %86 = vst.msk [vmem:[%s156_s1 + $0x4] sm:$0xf] %vm21_vm1, %v81_v4 }
  0x4e   :  { %87 = vst.msk [vmem:[%s156_s1 + $0x8] sm:$0xf] %vm21_vm1, %v82_v5 }
  0x4f   :  { %88 = vst.msk [vmem:[%s156_s1 + $0xc] sm:$0xf] %vm21_vm1, %v83_v6 }
  0x50   :  { %90 = vst.msk [vmem:[%s156_s1 + $0x10] sm:$0x3] %vm89_vm6, %v84_v7 }

</bundles_post_ra>
